<compile_context>
chip_gen: v7x
topology: tpu7x:2x2x1
jax: 0.10.0
libtpu: 0.0.40
codegen_flags: <defaults>
</compile_context>

<pallas_src>
import jax
import jax.numpy as jnp
from jax.experimental import pallas as pl
from jax.experimental.pallas import tpu as pltpu


def _diffusion_kernel(m_ref, x_ref, o_ref):
    # m_ref: (N, N)   fused update matrix M = I - step_size * L (VMEM-resident)
    # x_ref: (N, TD)  lane tile of the flattened features
    # o_ref: (N, TD)  same tile of the output (aliased with x_flat in HBM)
    o_ref[...] = jnp.dot(
        m_ref[...], x_ref[...], preferred_element_type=jnp.float32
    ).astype(o_ref.dtype)


def _choose_tile_d(n, d, itemsize, target_block_bytes):
    """Pick a lane tile: large (kernel is mem-bound), multiple of 128, or full D."""
    if n * d * itemsize <= 2 * target_block_bytes or d <= 128:
        return d  # whole feature dim in one block (full-extent last dim is OK)
    lanes = (target_block_bytes // (n * itemsize)) // 128 * 128
    lanes = max(128, lanes)
    return int(min(lanes, (d // 128) * 128))


def diffusion_layer(x, laplacian, step_size, *, target_block_bytes=2 << 20):
    """x: (N, C, H, W); laplacian: (N, N). Returns x - step_size * (L @ x.flatten(1))."""
    n = x.shape[0]
    d = 1
    for s in x.shape[1:]:
        d *= s
    x_flat = x.reshape(n, d)

    # Fold the residual update into one matrix: y = (I - step_size * L) @ x_flat.
    m = (jnp.eye(n, dtype=jnp.float32)
         - jnp.float32(step_size) * laplacian.astype(jnp.float32))
    m = m.astype(x.dtype)  # matched MXU operand dtypes; f32 accumulation in-kernel

    itemsize = jnp.dtype(x.dtype).itemsize
    tile_d = _choose_tile_d(n, d, itemsize, target_block_bytes)

    d_pad = pl.cdiv(d, tile_d) * tile_d
    if d_pad != d:
        # Zero-pad lanes so every block is full-width (keeps stores unmasked);
        # padded columns come out as zeros and are sliced off below.
        x_in = jnp.pad(x_flat, ((0, 0), (0, d_pad - d)))
    else:
        x_in = x_flat

    num_tiles = d_pad // tile_d

    out_flat = pl.pallas_call(
        _diffusion_kernel,
        out_shape=jax.ShapeDtypeStruct((n, d_pad), x.dtype),
        grid_spec=pltpu.PrefetchScalarGridSpec(
            num_scalar_prefetch=0,
            grid=(num_tiles,),
            in_specs=[
                pl.BlockSpec((n, n), lambda j: (0, 0)),       # M, resident every step
                pl.BlockSpec((n, tile_d), lambda j: (0, j)),  # x lane tile
            ],
            out_specs=pl.BlockSpec((n, tile_d), lambda j: (0, j)),
        ),
        compiler_params=pltpu.CompilerParams(
            dimension_semantics=("parallel",),   # D-tiles shard across v7x's 2 TCs
            vmem_limit_bytes=48 << 20,           # headroom, still < v7x 64 MiB VMEM
        ),
        input_output_aliases={1: 0},             # write result in place of x_flat
    )(m, x_in)

    if d_pad != d:
        out_flat = out_flat[:, :d]
    return out_flat.reshape(x.shape)


def _reference(x, laplacian, step_size):
    n = x.shape[0]
    x_flat = x.reshape(n, -1)
    return (x_flat - step_size * (laplacian @ x_flat)).reshape(x.shape)


if __name__ == "__main__":
    key = jax.random.PRNGKey(0)
    k_x, k_a = jax.random.split(key)

    # Small shapes consistent with the module: batch N=8, C=4, H=W=16.
    N, C, H, W = 8, 4, 16, 16
    x = jax.random.normal(k_x, (N, C, H, W), dtype=jnp.float32)

    # Deterministic synthetic graph laplacian L = D - A over the batch graph.
    adj_logits = jax.random.uniform(k_a, (N, N))
    adj = ((adj_logits + adj_logits.T) * 0.5 > 0.5).astype(jnp.float32)
    adj = adj * (1.0 - jnp.eye(N, dtype=jnp.float32))  # no self loops
    deg = jnp.diag(jnp.sum(adj, axis=1))
    laplacian = deg - adj

    step_size = 0.1

    out = diffusion_layer(x, laplacian, step_size)
    out = jax.block_until_ready(out)

    ref = _reference(x, laplacian, step_size)
    assert out.shape == x.shape and out.dtype == x.dtype
    assert jnp.allclose(out, ref, atol=1e-5, rtol=1e-5)

    print("KERNEL_OK")
</pallas_src>

<mosaic_0001>
module attributes {stable_mosaic.version = 11 : i64} {
  func.func @_diffusion_kernel(%arg0: i32, %arg1: memref<8x8xf32, #tpu.memory_space<vmem>>, %arg2: memref<8x1024xf32, #tpu.memory_space<vmem>>, %arg3: memref<8x1024xf32, #tpu.memory_space<vmem>>) attributes {dimension_semantics = [#tpu.dimension_semantics<parallel>], iteration_bounds = array<i64: 1>, scalar_prefetch = 0 : i64, scratch_operands = 0 : i64, tpu.core_type = #tpu.core_type<tc>, window_params = [{pipeline_mode = #tpu.pipeline_mode<synchronous>, transform_indices = @transform_0, window_bounds = array<i64: 8, 8>}, {transform_indices = @transform_1, window_bounds = array<i64: 8, 1024>}, {transform_indices = @transform_2, window_bounds = array<i64: 8, 1024>}]} {
    %c0 = arith.constant 0 : index
    %c0_0 = arith.constant 0 : index
    %0 = vector.load %arg1[%c0, %c0_0] : memref<8x8xf32, #tpu.memory_space<vmem>>, vector<8x8xf32>
    %c0_1 = arith.constant 0 : index
    %c0_2 = arith.constant 0 : index
    %1 = vector.load %arg2[%c0_1, %c0_2] : memref<8x1024xf32, #tpu.memory_space<vmem>>, vector<8x1024xf32>
    %cst = arith.constant dense<0.000000e+00> : vector<8x1024xf32>
    %2 = tpu.matmul %0, %1, %cst {dimension_numbers = #tpu.dot_dimension_numbers<[1], [0], [0], [1], [0, 0, 1, 1], [], []>} : vector<8x8xf32>, vector<8x1024xf32>, vector<8x1024xf32> -> vector<8x1024xf32>
    %c0_3 = arith.constant 0 : index
    %c0_4 = arith.constant 0 : index
    %3 = vector.load %arg3[%c0_3, %c0_4] : memref<8x1024xf32, #tpu.memory_space<vmem>>, vector<8x1024xf32>
    tpu.vector_store %arg3[%c0_3, %c0_4], %2 {strides = array<i32>} : memref<8x1024xf32, #tpu.memory_space<vmem>>, vector<8x1024xf32>,
    return
  }
  func.func @transform_0(%arg0: i32) -> (i32, i32) {
    %c0_i32 = arith.constant 0 : i32
    %c0_i32_0 = arith.constant 0 : i32
    %c0_i32_1 = arith.constant 0 : i32
    return %c0_i32, %c0_i32_0 : i32, i32
  }
  func.func @transform_1(%arg0: i32) -> (i32, i32) {
    %c0_i32 = arith.constant 0 : i32
    %c0_i32_0 = arith.constant 0 : i32
    return %c0_i32, %arg0 : i32, i32
  }
  func.func @transform_2(%arg0: i32) -> (i32, i32) {
    %c0_i32 = arith.constant 0 : i32
    %c0_i32_0 = arith.constant 0 : i32
    return %c0_i32, %arg0 : i32, i32
  }
}

</mosaic_0001>

<bundles_post_ra>
// kernel: tpu_custom_call.1
= control target key start
LH: loop header
LB: loop body
LE: loop exit
PB: predicated region body
PF: predicated region fallthrough
CT: control target
= control target key end

     0   :  { %7 = vsyncpa [#allocation3], 0  ;;  %s448_s0 = inlined_call_operand.vmem [shape: f32[8,8], index: 0, kind: input, shape index: {}]   ;;  %s449_s1 = inlined_call_operand.hbm [shape: f32[8,1024], index: 1, kind: input, shape index: {}, may-alias: {1,2}]   ;;  %s450_s2 = inlined_call_operand.hbm [shape: f32[8,1024], index: 2, kind: output, shape index: {}, may-alias: {1,2}]  }
   0x1   :  { %8 = vsyncpa [#allocation4], 0  ;;  %s399_s9 = smov [#allocation2]   ;;  %s351_s13 = scalar_lea.hbm %s449_s1, 1024 }
   0x2   :  { %s17_s10 = sshll.u32 %s399_s9, 4  ;;  %p352_p0 = scmp.ne.s32.totalorder %s449_s1, %s351_s13  ;;  %s18_s10 = int_to_ptr.vmem [resolvable:$true] %s17_s10 }
   0x3   :  { %p355_p1 = scmp.lt.u32.totalorder %s351_s13, %s449_s1 }
   0x5   :  { %p357_p2 = pnand %p355_p1, %p352_p0 }
   0x7   :  { %360 = shalt.err (!%p357_p2)
}
   0x8   :  { %s361_s18 = scalar_lea.vmem %s18_s10, 1024  ;;  %p366_p4 = scmp.lt.s32.totalorder %s18_s10, %s18_s10 }
   0x9   :  { %p362_p3 = scmp.ne.s32.totalorder %s18_s10, %s361_s18  ;;  %p367_p5 = scmp.lt.s32.totalorder %s361_s18, %s361_s18 }
   0xb   :  { %p368_p6 = por %p367_p5, %p366_p4 }
   0xd   :  { %p369_p7 = pnand %p368_p6, %p362_p3 }
   0xf   :  { %372 = shalt.err (!%p369_p7)
}
  0x10   :  { %20 = dma.hbm_to_vmem [thread:$0]  %s449_s1, 1024, %s18_s10, [#allocation3]  }
  0x11   :  { %395 = dma.done.wait [#allocation3], 1024  }
  0x12   :  { %396 = vsyncadd [#allocation3], 4294966272  ;;  %v400_v0 = vmov 0.0   ;;  %v26_v1 = vld [vmem:[#allocation2 + $0x8] sm:$0xff]  ;;  %v28_v2 = vld [vmem:[#allocation2 + $0x18] sm:$0xff]  ;;  %vm33_vm0 = vcmask 64512  }
  0x13   :  { %101 = vmatprep.mubr.f32.mxu0 %v400_v0  ;;  %172 = vmatprep.mubr.f32.mxu1 %v400_v0  ;;  %v25_v3 = vld [vmem:[#allocation2] sm:$0xff]  ;;  %v27_v4 = vld [vmem:[#allocation2 + $0x10] sm:$0xff]  ;;  %v30_v6 = vld [vmem:[#allocation2 + $0x28] sm:$0xff] }
  0x14   :  { %37 = vmatprep.subr.mxu0 %v26_v1  ;;  %108 = vmatprep.subr.mxu1 %v28_v2  ;;  %v24_v5 = vld [vmem:[%s448_s0] sm:$0xff]  ;;  %v32_v7 = vld [vmem:[#allocation2 + $0x38] sm:$0xff]  ;;  %v31_v9 = vld [vmem:[#allocation2 + $0x30] sm:$0xff]  ;;  %s401_s0 = smov [#allocation5]  }
  0x15   :  { %38 = vmatpush1.msra.mxu0 %v25_v3  ;;  %109 = vmatpush1.msra.mxu1 %v27_v4  ;;  %v29_v8 = vld [vmem:[#allocation2 + $0x20] sm:$0xff]  ;;  %s335_s1 = sshll.u32 %s401_s0, 4  ;;  %s336_s1 = int_to_ptr.vmem [resolvable:$true] %s335_s1 }
  0x16   :  { %344 = vmatmul.mubr.msk.f32.vlgmr.msra.gmra.mrb[0].mxu0 %vm33_vm0, %v24_v5  ;;  %345 = vmatmul.mubr.msk.f32.vlgmr.msra.gmra.mrb[0].mxu1 %vm33_vm0, %v24_v5  ;;  %s373_s23 = scalar_lea.vmem %s336_s1, 1024  ;;  %p378_p9 = scmp.lt.s32.totalorder %s336_s1, %s336_s1 }
  0x17   :  { %179 = vmatprep.subr.mxu0 %v30_v6  ;;  %250 = vmatprep.subr.mxu1 %v32_v7  ;;  %p374_p8 = scmp.ne.s32.totalorder %s336_s1, %s373_s23  ;;  %p379_p10 = scmp.lt.s32.totalorder %s373_s23, %s373_s23 }
  0x18   :  { %180 = vmatpush1.msra.mxu0 %v29_v8  ;;  %251 = vmatpush1.msra.mxu1 %v31_v9 }
  0x19   :  { %243 = vmatprep.mubr.f32.mxu0 %v400_v0  ;;  %314 = vmatprep.mubr.f32.mxu1 %v400_v0  ;;  %p380_p11 = por %p379_p10, %p378_p9 }
  0x1a   :  { %346 = vmatmul.mubr.msk.f32.vlgmr.msra.gmra.mrb[2].mxu0 %vm33_vm0, %v24_v5  ;;  %347 = vmatmul.mubr.msk.f32.vlgmr.msra.gmra.mrb[2].mxu1 %vm33_vm0, %v24_v5 }
  0x1b   :  { %p381_p12 = pnand %p380_p11, %p374_p8 }
  0xe9   :  { %v103_v10 = vpop.f32.mrb[0].mxu0  ;;  %v174_v11 = vpop.f32.mrb[0].mxu1 }
  0xea   :  { %321 = vst [vmem:[#allocation5] sm:$0xff] %v103_v10  ;;  %323 = vst [vmem:[#allocation5 + $0x10] sm:$0xff] %v174_v11  ;;  %v105_v12 = vpop.f32.mrb[1].mxu0  ;;  %v176_v13 = vpop.f32.mrb[1].mxu1 }
  0xeb   :  { %322 = vst [vmem:[#allocation5 + $0x8] sm:$0xff] %v105_v12  ;;  %324 = vst [vmem:[#allocation5 + $0x18] sm:$0xff] %v176_v13 }
  0xed   :  { %v245_v14 = vpop.f32.mrb[2].mxu0  ;;  %v316_v15 = vpop.f32.mrb[2].mxu1 }
  0xee   :  { %325 = vst [vmem:[#allocation5 + $0x20] sm:$0xff] %v245_v14  ;;  %327 = vst [vmem:[#allocation5 + $0x30] sm:$0xff] %v316_v15  ;;  %v247_v16 = vpop.f32.mrb[3].mxu0  ;;  %v318_v17 = vpop.f32.mrb[3].mxu1 }
  0xef   :  { %326 = vst [vmem:[#allocation5 + $0x28] sm:$0xff] %v247_v16  ;;  %328 = vst [vmem:[#allocation5 + $0x38] sm:$0xff] %v318_v17 }
  0xf0   :  { %384 = shalt.err (!%p381_p12)
}
  0xf1   :  { %s385_s26 = scalar_lea.hbm %s450_s2, 1024 }
  0xf2   :  { %p386_p13 = scmp.ne.s32.totalorder %s450_s2, %s385_s26  ;;  %p389_p0 = scmp.lt.u32.totalorder %s385_s26, %s450_s2 }
  0xf4   :  { %p391_p1 = pnand %p389_p0, %p386_p13 }
  0xf6   :  { %394 = shalt.err (!%p391_p1)
}
  0xf7   :  { %338 = dma.vmem_to_hbm [thread:$0]  %s336_s1, 1024, %s450_s2, [#allocation4]  }
  0xf8   :  { %397 = dma.done.wait [#allocation4], 1024  }
  0xf9   :  { %398 = vsyncadd [#allocation4], 4294966272 }
  0xfa   :  { %342 = vsyncpa [#allocation3], 1 }
  0xfb   :  { %343 = vsyncpa [#allocation4], 1 }

</bundles_post_ra>
